<compile_context>
chip_gen: v6e
topology: v6e:2x2x1
jax: 0.10.0
libtpu: 0.0.40
codegen_flags: <defaults>
</compile_context>

<pallas_src>
import functools
import math

import jax
import jax.numpy as jnp
from jax.experimental import pallas as pl
from jax.experimental.pallas import tpu as pltpu  # noqa: F401  (TPU backend)


def mha_kernel(q_ref, k_ref, v_ref, mask_ref,
               wqT_ref, bq_ref, wkT_ref, bk_ref, wvT_ref, bv_ref,
               woT_ref, bo_ref, out_ref, *, B, S, D, h, d_k):
    """Single-invocation multi-head attention forward.

    Shapes:
      q/k/v:        (B, S, D)
      mask:         (B, S, S)   1 = keep, 0 = mask out
      wqT/wkT/wvT:  (D, D)      W^T   (1/sqrt(d_k) pre-folded into wqT)
      bq/bk/bv:     (1, D)      (1/sqrt(d_k) pre-folded into bq)
      woT:          (D, D)      Wo^T
      bo:           (1, D)
      out:          (B, S, D)
    """
    BS = B * S
    N = h * B

    # Major-dim only reshapes (no lane/sublane relayout).
    q2 = q_ref[...].reshape(BS, D)
    k2 = k_ref[...].reshape(BS, D)
    v2 = v_ref[...].reshape(BS, D)

    # Full-width projections: one (BS, D) @ (D, D) MXU matmul each.
    Q = jnp.dot(q2, wqT_ref[...], preferred_element_type=jnp.float32) + bq_ref[...]
    K = jnp.dot(k2, wkT_ref[...], preferred_element_type=jnp.float32) + bk_ref[...]
    V = jnp.dot(v2, wvT_ref[...], preferred_element_type=jnp.float32) + bv_ref[...]

    def split_heads(x2d):
        # (BS, D) -> (h*B, S, d_k), head-major.  Lane slice per head (cheap),
        # stacked along a new leading (major) dim; no activation duplication.
        heads = [x2d[:, i * d_k:(i + 1) * d_k].reshape(B, S, d_k)
                 for i in range(h)]
        return jnp.concatenate(heads, axis=0)

    Qh = split_heads(Q)            # (N, S, d_k)
    Kh = split_heads(K)
    Vh = split_heads(V)

    # Scores (scale already folded into Q).  Batched over N = h*B heads.
    s = jnp.einsum('nqd,nkd->nqk', Qh, Kh,
                   preferred_element_type=jnp.float32)          # (N, S, S)

    # Additive mask bias computed ONCE, broadcast over heads inside the add.
    bias = jnp.where(mask_ref[...] == 0.0, -1.0e9, 0.0)          # (B, S, S)
    s = (s.reshape(h, B, S, S) + bias[None]).reshape(N, S, S)

    # Numerically stable softmax with exact normalization.
    s = s - jnp.max(s, axis=-1, keepdims=True)
    p = jnp.exp(s)
    p = p / jnp.sum(p, axis=-1, keepdims=True)
    # dropout(p) is identity in eval mode.

    ctx = jnp.einsum('nqk,nkd->nqd', p, Vh,
                     preferred_element_type=jnp.float32)         # (N, S, d_k)

    # Merge heads back (lane concat) and do ONE output-projection matmul.
    ctx2 = jnp.concatenate([ctx[i * B:(i + 1) * B] for i in range(h)],
                           axis=-1)                              # (B, S, D)
    out = jnp.dot(ctx2.reshape(BS, D), woT_ref[...],
                  preferred_element_type=jnp.float32) + bo_ref[...]
    out_ref[...] = out.reshape(B, S, D).astype(out_ref.dtype)


def mha_forward(q, k, v, mask, params, h):
    B, S, D = q.shape
    assert D % h == 0
    d_k = D // h
    wq, bq, wk, bk, wv, bv, wo, bo = params

    # Host-side constant prep (folds into the parameters, zero kernel cost):
    # nn.Linear computes y = x @ W^T + b, so pre-transpose all weights and
    # fold the 1/sqrt(d_k) attention scale into the query projection.
    scale = 1.0 / math.sqrt(d_k)
    wqT = jnp.transpose(wq) * scale
    bq2 = (bq * scale).reshape(1, D)
    wkT = jnp.transpose(wk)
    bk2 = bk.reshape(1, D)
    wvT = jnp.transpose(wv)
    bv2 = bv.reshape(1, D)
    woT = jnp.transpose(wo)
    bo2 = bo.reshape(1, D)

    mask3 = mask.reshape(B, S, S).astype(jnp.float32)  # drop broadcast head dim

    kernel = functools.partial(mha_kernel, B=B, S=S, D=D, h=h, d_k=d_k)

    # Single invocation, no grid: every operand is tiny and lives whole in
    # VMEM (default BlockSpecs = full arrays).
    return pl.pallas_call(
        kernel,
        out_shape=jax.ShapeDtypeStruct((B, S, D), q.dtype),
    )(q, k, v, mask3, wqT, bq2, wkT, bk2, wvT, bv2, woT, bo2)


def ref_forward(q, k, v, mask, params, h):
    """Pure-JAX reference mirroring the PyTorch forward (eval mode)."""
    wq, bq, wk, bk, wv, bv, wo, bo = params
    B, S, D = q.shape
    d_k = D // h
    Q = q @ wq.T + bq
    K = k @ wk.T + bk
    V = v @ wv.T + bv
    Qh = Q.reshape(B, S, h, d_k).transpose(0, 2, 1, 3)
    Kh = K.reshape(B, S, h, d_k).transpose(0, 2, 1, 3)
    Vh = V.reshape(B, S, h, d_k).transpose(0, 2, 1, 3)
    s = jnp.einsum('bhqd,bhkd->bhqk', Qh, Kh) / math.sqrt(d_k)
    s = jnp.where(mask == 0, -1.0e9, s)
    p = jax.nn.softmax(s, axis=-1)
    ctx = jnp.einsum('bhqk,bhkd->bhqd', p, Vh)
    ctx = ctx.transpose(0, 2, 1, 3).reshape(B, S, D)
    return ctx @ wo.T + bo


if __name__ == "__main__":
    B, S, D, H = 2, 8, 32, 4      # batch, seq, d_model, heads  (d_k = 8)

    key = jax.random.PRNGKey(0)
    keys = jax.random.split(key, 12)

    # Deterministic "Linear"-style init: U(-1/sqrt(D), 1/sqrt(D)).
    bound = 1.0 / math.sqrt(D)

    def lin(kw, kb):
        w = jax.random.uniform(kw, (D, D), jnp.float32, -bound, bound)
        b = jax.random.uniform(kb, (D,), jnp.float32, -bound, bound)
        return w, b

    wq, bq = lin(keys[0], keys[1])
    wk, bk = lin(keys[2], keys[3])
    wv, bv = lin(keys[4], keys[5])
    wo, bo = lin(keys[6], keys[7])
    params = (wq, bq, wk, bk, wv, bv, wo, bo)

    q = jax.random.normal(keys[8], (B, S, D), jnp.float32)
    k = jax.random.normal(keys[9], (B, S, D), jnp.float32)
    v = jax.random.normal(keys[10], (B, S, D), jnp.float32)
    # Causal mask, broadcast over heads: (B, 1, S, S), 1 = keep, 0 = mask.
    causal = jnp.tril(jnp.ones((S, S), jnp.float32))
    mask = jnp.broadcast_to(causal[None, None], (B, 1, S, S))

    out = mha_forward(q, k, v, mask, params, H)
    out = jax.block_until_ready(out)

    expected = ref_forward(q, k, v, mask, params, H)
    assert out.shape == (B, S, D)
    # Softmax is now exact; the tolerance only absorbs MXU multi-pass vs XLA
    # matmul precision differences (observed errors are ~1e-3 or below).
    assert jnp.allclose(out, expected, atol=1e-2, rtol=1e-2), \
        f"max abs err {jnp.max(jnp.abs(out - expected))}"

    print("KERNEL_OK")
</pallas_src>

<mosaic_0001>
module attributes {stable_mosaic.version = 11 : i64} {
  func.func @mha_kernel(%arg0: memref<2x8x32xf32, #tpu.memory_space<vmem>>, %arg1: memref<2x8x32xf32, #tpu.memory_space<vmem>>, %arg2: memref<2x8x32xf32, #tpu.memory_space<vmem>>, %arg3: memref<2x8x8xf32, #tpu.memory_space<vmem>>, %arg4: memref<32x32xf32, #tpu.memory_space<vmem>>, %arg5: memref<1x32xf32, #tpu.memory_space<vmem>>, %arg6: memref<32x32xf32, #tpu.memory_space<vmem>>, %arg7: memref<1x32xf32, #tpu.memory_space<vmem>>, %arg8: memref<32x32xf32, #tpu.memory_space<vmem>>, %arg9: memref<1x32xf32, #tpu.memory_space<vmem>>, %arg10: memref<32x32xf32, #tpu.memory_space<vmem>>, %arg11: memref<1x32xf32, #tpu.memory_space<vmem>>, %arg12: memref<2x8x32xf32, #tpu.memory_space<vmem>>) attributes {dimension_semantics = [], scalar_prefetch = 0 : i64, scratch_operands = 0 : i64, tpu.core_type = #tpu.core_type<tc>} {
    %c0 = arith.constant 0 : index
    %c0_0 = arith.constant 0 : index
    %c0_1 = arith.constant 0 : index
    %0 = vector.load %arg0[%c0, %c0_0, %c0_1] : memref<2x8x32xf32, #tpu.memory_space<vmem>>, vector<2x8x32xf32>
    %1 = vector.shape_cast %0 : vector<2x8x32xf32> to vector<16x32xf32>
    %c0_2 = arith.constant 0 : index
    %c0_3 = arith.constant 0 : index
    %c0_4 = arith.constant 0 : index
    %2 = vector.load %arg1[%c0_2, %c0_3, %c0_4] : memref<2x8x32xf32, #tpu.memory_space<vmem>>, vector<2x8x32xf32>
    %3 = vector.shape_cast %2 : vector<2x8x32xf32> to vector<16x32xf32>
    %c0_5 = arith.constant 0 : index
    %c0_6 = arith.constant 0 : index
    %c0_7 = arith.constant 0 : index
    %4 = vector.load %arg2[%c0_5, %c0_6, %c0_7] : memref<2x8x32xf32, #tpu.memory_space<vmem>>, vector<2x8x32xf32>
    %5 = vector.shape_cast %4 : vector<2x8x32xf32> to vector<16x32xf32>
    %c0_8 = arith.constant 0 : index
    %c0_9 = arith.constant 0 : index
    %6 = vector.load %arg4[%c0_8, %c0_9] : memref<32x32xf32, #tpu.memory_space<vmem>>, vector<32x32xf32>
    %cst = arith.constant dense<0.000000e+00> : vector<16x32xf32>
    %7 = tpu.matmul %1, %6, %cst {dimension_numbers = #tpu.dot_dimension_numbers<[1], [0], [0], [1], [0, 0, 1, 1], [], []>} : vector<16x32xf32>, vector<32x32xf32>, vector<16x32xf32> -> vector<16x32xf32>
    %c0_10 = arith.constant 0 : index
    %c0_11 = arith.constant 0 : index
    %8 = vector.load %arg5[%c0_10, %c0_11] : memref<1x32xf32, #tpu.memory_space<vmem>>, vector<1x32xf32>
    %9 = vector.broadcast %8 : vector<1x32xf32> to vector<16x32xf32>
    %10 = arith.addf %7, %9 : vector<16x32xf32>
    %c0_12 = arith.constant 0 : index
    %c0_13 = arith.constant 0 : index
    %11 = vector.load %arg6[%c0_12, %c0_13] : memref<32x32xf32, #tpu.memory_space<vmem>>, vector<32x32xf32>
    %cst_14 = arith.constant dense<0.000000e+00> : vector<16x32xf32>
    %12 = tpu.matmul %3, %11, %cst_14 {dimension_numbers = #tpu.dot_dimension_numbers<[1], [0], [0], [1], [0, 0, 1, 1], [], []>} : vector<16x32xf32>, vector<32x32xf32>, vector<16x32xf32> -> vector<16x32xf32>
    %c0_15 = arith.constant 0 : index
    %c0_16 = arith.constant 0 : index
    %13 = vector.load %arg7[%c0_15, %c0_16] : memref<1x32xf32, #tpu.memory_space<vmem>>, vector<1x32xf32>
    %14 = vector.broadcast %13 : vector<1x32xf32> to vector<16x32xf32>
    %15 = arith.addf %12, %14 : vector<16x32xf32>
    %c0_17 = arith.constant 0 : index
    %c0_18 = arith.constant 0 : index
    %16 = vector.load %arg8[%c0_17, %c0_18] : memref<32x32xf32, #tpu.memory_space<vmem>>, vector<32x32xf32>
    %cst_19 = arith.constant dense<0.000000e+00> : vector<16x32xf32>
    %17 = tpu.matmul %5, %16, %cst_19 {dimension_numbers = #tpu.dot_dimension_numbers<[1], [0], [0], [1], [0, 0, 1, 1], [], []>} : vector<16x32xf32>, vector<32x32xf32>, vector<16x32xf32> -> vector<16x32xf32>
    %c0_20 = arith.constant 0 : index
    %c0_21 = arith.constant 0 : index
    %18 = vector.load %arg9[%c0_20, %c0_21] : memref<1x32xf32, #tpu.memory_space<vmem>>, vector<1x32xf32>
    %19 = vector.broadcast %18 : vector<1x32xf32> to vector<16x32xf32>
    %20 = arith.addf %17, %19 : vector<16x32xf32>
    %21 = vector.extract_strided_slice %10 {offsets = [0, 0], sizes = [16, 8], strides = [1, 1]} : vector<16x32xf32> to vector<16x8xf32>
    %22 = vector.shape_cast %21 : vector<16x8xf32> to vector<2x8x8xf32>
    %23 = vector.extract_strided_slice %10 {offsets = [0, 8], sizes = [16, 8], strides = [1, 1]} : vector<16x32xf32> to vector<16x8xf32>
    %24 = vector.shape_cast %23 : vector<16x8xf32> to vector<2x8x8xf32>
    %25 = vector.extract_strided_slice %10 {offsets = [0, 16], sizes = [16, 8], strides = [1, 1]} : vector<16x32xf32> to vector<16x8xf32>
    %26 = vector.shape_cast %25 : vector<16x8xf32> to vector<2x8x8xf32>
    %27 = vector.extract_strided_slice %10 {offsets = [0, 24], sizes = [16, 8], strides = [1, 1]} : vector<16x32xf32> to vector<16x8xf32>
    %28 = vector.shape_cast %27 : vector<16x8xf32> to vector<2x8x8xf32>
    %29 = tpu.concatenate %22, %24, %26, %28 in 0 : vector<2x8x8xf32>, vector<2x8x8xf32>, vector<2x8x8xf32>, vector<2x8x8xf32> -> vector<8x8x8xf32>
    %30 = vector.extract_strided_slice %15 {offsets = [0, 0], sizes = [16, 8], strides = [1, 1]} : vector<16x32xf32> to vector<16x8xf32>
    %31 = vector.shape_cast %30 : vector<16x8xf32> to vector<2x8x8xf32>
    %32 = vector.extract_strided_slice %15 {offsets = [0, 8], sizes = [16, 8], strides = [1, 1]} : vector<16x32xf32> to vector<16x8xf32>
    %33 = vector.shape_cast %32 : vector<16x8xf32> to vector<2x8x8xf32>
    %34 = vector.extract_strided_slice %15 {offsets = [0, 16], sizes = [16, 8], strides = [1, 1]} : vector<16x32xf32> to vector<16x8xf32>
    %35 = vector.shape_cast %34 : vector<16x8xf32> to vector<2x8x8xf32>
    %36 = vector.extract_strided_slice %15 {offsets = [0, 24], sizes = [16, 8], strides = [1, 1]} : vector<16x32xf32> to vector<16x8xf32>
    %37 = vector.shape_cast %36 : vector<16x8xf32> to vector<2x8x8xf32>
    %38 = tpu.concatenate %31, %33, %35, %37 in 0 : vector<2x8x8xf32>, vector<2x8x8xf32>, vector<2x8x8xf32>, vector<2x8x8xf32> -> vector<8x8x8xf32>
    %39 = vector.extract_strided_slice %20 {offsets = [0, 0], sizes = [16, 8], strides = [1, 1]} : vector<16x32xf32> to vector<16x8xf32>
    %40 = vector.shape_cast %39 : vector<16x8xf32> to vector<2x8x8xf32>
    %41 = vector.extract_strided_slice %20 {offsets = [0, 8], sizes = [16, 8], strides = [1, 1]} : vector<16x32xf32> to vector<16x8xf32>
    %42 = vector.shape_cast %41 : vector<16x8xf32> to vector<2x8x8xf32>
    %43 = vector.extract_strided_slice %20 {offsets = [0, 16], sizes = [16, 8], strides = [1, 1]} : vector<16x32xf32> to vector<16x8xf32>
    %44 = vector.shape_cast %43 : vector<16x8xf32> to vector<2x8x8xf32>
    %45 = vector.extract_strided_slice %20 {offsets = [0, 24], sizes = [16, 8], strides = [1, 1]} : vector<16x32xf32> to vector<16x8xf32>
    %46 = vector.shape_cast %45 : vector<16x8xf32> to vector<2x8x8xf32>
    %47 = tpu.concatenate %40, %42, %44, %46 in 0 : vector<2x8x8xf32>, vector<2x8x8xf32>, vector<2x8x8xf32>, vector<2x8x8xf32> -> vector<8x8x8xf32>
    "tpu.trace_start"() <{level = 10 : i32, message = "nqd,nkd->nqk"}> : () -> ()
    %cst_22 = arith.constant dense<0.000000e+00> : vector<8x8x8xf32>
    %48 = tpu.matmul %29, %38, %cst_22 {dimension_numbers = #tpu.dot_dimension_numbers<[2], [2], [1], [1], [0, 0, 0, 1, 1, 1], [0], [0]>} : vector<8x8x8xf32>, vector<8x8x8xf32>, vector<8x8x8xf32> -> vector<8x8x8xf32>
    "tpu.trace_stop"() : () -> ()
    %c0_23 = arith.constant 0 : index
    %c0_24 = arith.constant 0 : index
    %c0_25 = arith.constant 0 : index
    %49 = vector.load %arg3[%c0_23, %c0_24, %c0_25] : memref<2x8x8xf32, #tpu.memory_space<vmem>>, vector<2x8x8xf32>
    %cst_26 = arith.constant 0.000000e+00 : f32
    %50 = vector.broadcast %cst_26 : f32 to vector<2x8x8xf32>
    %51 = arith.cmpf oeq, %49, %50 : vector<2x8x8xf32>
    %cst_27 = arith.constant -1.000000e+09 : f32
    %cst_28 = arith.constant 0.000000e+00 : f32
    %52 = vector.broadcast %cst_27 : f32 to vector<2x8x8xf32>
    %53 = vector.broadcast %cst_28 : f32 to vector<2x8x8xf32>
    %54 = arith.select %51, %52, %53 : vector<2x8x8xi1>, vector<2x8x8xf32>
    %55 = vector.shape_cast %48 : vector<8x8x8xf32> to vector<4x2x8x8xf32>
    %56 = vector.shape_cast %54 : vector<2x8x8xf32> to vector<1x2x8x8xf32>
    %57 = vector.broadcast %56 : vector<1x2x8x8xf32> to vector<4x2x8x8xf32>
    %58 = arith.addf %55, %57 : vector<4x2x8x8xf32>
    %59 = vector.shape_cast %58 : vector<4x2x8x8xf32> to vector<8x8x8xf32>
    %cst_29 = arith.constant dense<0xFF800000> : vector<8x8xf32>
    %60 = vector.multi_reduction <maximumf>, %59, %cst_29 [2] : vector<8x8x8xf32> to vector<8x8xf32>
    %61 = vector.shape_cast %60 : vector<8x8xf32> to vector<8x8x1xf32>
    %62 = vector.broadcast %61 : vector<8x8x1xf32> to vector<8x8x8xf32>
    %63 = arith.subf %59, %62 : vector<8x8x8xf32>
    %64 = math.exp %63 : vector<8x8x8xf32>
    %cst_30 = arith.constant dense<0.000000e+00> : vector<8x8xf32>
    %65 = vector.multi_reduction <add>, %64, %cst_30 [2] : vector<8x8x8xf32> to vector<8x8xf32>
    %66 = vector.shape_cast %65 : vector<8x8xf32> to vector<8x8x1xf32>
    %67 = vector.broadcast %66 : vector<8x8x1xf32> to vector<8x8x8xf32>
    %68 = arith.divf %64, %67 : vector<8x8x8xf32>
    "tpu.trace_start"() <{level = 10 : i32, message = "nqk,nkd->nqd"}> : () -> ()
    %cst_31 = arith.constant dense<0.000000e+00> : vector<8x8x8xf32>
    %69 = tpu.matmul %68, %47, %cst_31 {dimension_numbers = #tpu.dot_dimension_numbers<[2], [1], [1], [2], [0, 0, 0, 1, 1, 2], [0], [0]>} : vector<8x8x8xf32>, vector<8x8x8xf32>, vector<8x8x8xf32> -> vector<8x8x8xf32>
    "tpu.trace_stop"() : () -> ()
    %70 = vector.extract_strided_slice %69 {offsets = [0, 0, 0], sizes = [2, 8, 8], strides = [1, 1, 1]} : vector<8x8x8xf32> to vector<2x8x8xf32>
    %71 = vector.extract_strided_slice %69 {offsets = [2, 0, 0], sizes = [2, 8, 8], strides = [1, 1, 1]} : vector<8x8x8xf32> to vector<2x8x8xf32>
    %72 = vector.extract_strided_slice %69 {offsets = [4, 0, 0], sizes = [2, 8, 8], strides = [1, 1, 1]} : vector<8x8x8xf32> to vector<2x8x8xf32>
    %73 = vector.extract_strided_slice %69 {offsets = [6, 0, 0], sizes = [2, 8, 8], strides = [1, 1, 1]} : vector<8x8x8xf32> to vector<2x8x8xf32>
    %74 = tpu.concatenate %70, %71, %72, %73 in 2 : vector<2x8x8xf32>, vector<2x8x8xf32>, vector<2x8x8xf32>, vector<2x8x8xf32> -> vector<2x8x32xf32>
    %75 = vector.shape_cast %74 : vector<2x8x32xf32> to vector<16x32xf32>
    %c0_32 = arith.constant 0 : index
    %c0_33 = arith.constant 0 : index
    %76 = vector.load %arg10[%c0_32, %c0_33] : memref<32x32xf32, #tpu.memory_space<vmem>>, vector<32x32xf32>
    %cst_34 = arith.constant dense<0.000000e+00> : vector<16x32xf32>
    %77 = tpu.matmul %75, %76, %cst_34 {dimension_numbers = #tpu.dot_dimension_numbers<[1], [0], [0], [1], [0, 0, 1, 1], [], []>} : vector<16x32xf32>, vector<32x32xf32>, vector<16x32xf32> -> vector<16x32xf32>
    %c0_35 = arith.constant 0 : index
    %c0_36 = arith.constant 0 : index
    %78 = vector.load %arg11[%c0_35, %c0_36] : memref<1x32xf32, #tpu.memory_space<vmem>>, vector<1x32xf32>
    %79 = vector.broadcast %78 : vector<1x32xf32> to vector<16x32xf32>
    %80 = arith.addf %77, %79 : vector<16x32xf32>
    %81 = vector.shape_cast %80 : vector<16x32xf32> to vector<2x8x32xf32>
    %c0_37 = arith.constant 0 : index
    %c0_38 = arith.constant 0 : index
    %c0_39 = arith.constant 0 : index
    %82 = vector.load %arg12[%c0_37, %c0_38, %c0_39] : memref<2x8x32xf32, #tpu.memory_space<vmem>>, vector<2x8x32xf32>
    tpu.vector_store %arg12[%c0_37, %c0_38, %c0_39], %81 {strides = array<i32>} : memref<2x8x32xf32, #tpu.memory_space<vmem>>, vector<2x8x32xf32>,
    return
  }
}

</mosaic_0001>

<bundles_post_ra>
// kernel: tpu_custom_call.1
= control target key start
LH: loop header
LB: loop body
LE: loop exit
PB: predicated region body
PF: predicated region fallthrough
CT: control target
= control target key end

     0   :  { %17 = vsyncpa [#allocation3], 0  ;;  %s2657_s0 = inlined_call_operand.hbm [shape: f32[2,8,32], index: 0, kind: input, shape index: {}]   ;;  %s2658_s1 = inlined_call_operand.hbm [shape: f32[2,8,32], index: 1, kind: input, shape index: {}]   ;;  %s2659_s2 = inlined_call_operand.hbm [shape: f32[2,8,32], index: 2, kind: input, shape index: {}]   ;;  %s2660_s3 = inlined_call_operand.hbm [shape: f32[2,8,8], index: 3, kind: input, shape index: {}]   ;;  %s2661_s4 = inlined_call_operand.hbm [shape: f32[32,32], index: 4, kind: input, shape index: {}]   ;;  %s2662_s5 = inlined_call_operand.vmem [shape: f32[1,32], index: 5, kind: input, shape index: {}]   ;;  %s2663_s6 = inlined_call_operand.hbm [shape: f32[32,32], index: 6, kind: input, shape index: {}]   ;;  %s2664_s7 = inlined_call_operand.vmem [shape: f32[1,32], index: 7, kind: input, shape index: {}]   ;;  %s2665_s8 = inlined_call_operand.hbm [shape: f32[32,32], index: 8, kind: input, shape index: {}]   ;;  %s2666_s9 = inlined_call_operand.vmem [shape: f32[1,32], index: 9, kind: input, shape index: {}]   ;;  %s2667_s10 = inlined_call_operand.hbm [shape: f32[32,32], index: 10, kind: input, shape index: {}]   ;;  %s2668_s11 = inlined_call_operand.vmem [shape: f32[1,32], index: 11, kind: input, shape index: {}]   ;;  %s2669_s12 = inlined_call_operand.hbm [shape: f32[2,8,32], index: 12, kind: output, shape index: {}]  }
   0x1   :  { %18 = vsyncpa [#allocation6], 0 }
   0x2   :  { %19 = vsyncpa [#allocation9], 0 }
   0x3   :  { %20 = vsyncpa [#allocation12], 0 }
   0x4   :  { %21 = vsyncpa [#allocation15], 0 }
   0x5   :  { %22 = vsyncpa [#allocation4], 0  ;;  %s2366_s21 = smov [#allocation5]   ;;  %s2367_s23 = smov [#allocation8]  }
   0x6   :  { %s40_s22 = sshll.u32 %s2366_s21, 4  ;;  %s64_s24 = sshll.u32 %s2367_s23, 4  ;;  %s41_s22 = int_to_ptr.vmem [resolvable:$true] %s40_s22  ;;  %s65_s24 = int_to_ptr.vmem [resolvable:$true] %s64_s24 }
   0x7   :  { %s2182_s25 = scalar_lea.vmem %s41_s22, 256  ;;  %p2187_p1 = scmp.lt.s32.totalorder %s41_s22, %s41_s22 }
   0x8   :  { %p2183_p0 = scmp.ne.s32.totalorder %s41_s22, %s2182_s25  ;;  %p2188_p2 = scmp.lt.s32.totalorder %s2182_s25, %s2182_s25 }
   0xa   :  { %p2189_p3 = por %p2188_p2, %p2187_p1 }
   0xc   :  { %p2190_p4 = pnand %p2189_p3, %p2183_p0 }
   0xe   :  { %2193 = shalt.err (!%p2190_p4)
}
   0xf   :  { %s2368_s26 = smov 128   ;;  %s2369_s27 = smov 8  }
  0x10   :  { %46 = dma.hbm_to_vmem [thread:$0]  %s2658_s1, 256, %s41_s22, [#allocation6], %s2368_s26, %s2368_s26, %s2369_s27  }
  0x11   :  { %s2202_s30 = scalar_lea.vmem %s65_s24, 256  ;;  %p2207_p6 = scmp.lt.s32.totalorder %s65_s24, %s65_s24 }
  0x12   :  { %p2203_p5 = scmp.ne.s32.totalorder %s65_s24, %s2202_s30  ;;  %p2208_p7 = scmp.lt.s32.totalorder %s2202_s30, %s2202_s30 }
  0x14   :  { %p2209_p8 = por %p2208_p7, %p2207_p6 }
  0x16   :  { %p2210_p9 = pnand %p2209_p8, %p2203_p5 }
  0x18   :  { %2213 = shalt.err (!%p2210_p9)
}
  0x19   :  { %70 = dma.hbm_to_vmem [thread:$0]  %s2660_s3, 256, %s65_s24, [#allocation9], %s2368_s26, %s2368_s26, %s2369_s27  }
  0x1a   :  { %s2370_s15 = smov [#allocation11]   ;;  %s2371_s17 = smov [#allocation2]  }
  0x1b   :  { %s90_s16 = sshll.u32 %s2370_s15, 4  ;;  %s28_s18 = sshll.u32 %s2371_s17, 4  ;;  %s91_s16 = int_to_ptr.vmem [resolvable:$true] %s90_s16  ;;  %s29_s18 = int_to_ptr.vmem [resolvable:$true] %s28_s18 }
  0x1c   :  { %s2222_s1 = scalar_lea.vmem %s91_s16, 512  ;;  %p2227_p11 = scmp.lt.s32.totalorder %s91_s16, %s91_s16 }
  0x1d   :  { %p2223_p10 = scmp.ne.s32.totalorder %s91_s16, %s2222_s1  ;;  %p2228_p12 = scmp.lt.s32.totalorder %s2222_s1, %s2222_s1 }
  0x1f   :  { %p2229_p13 = por %p2228_p12, %p2227_p11 }
  0x21   :  { %p2230_p0 = pnand %p2229_p13, %p2223_p10 }
  0x23   :  { %2233 = shalt.err (!%p2230_p0)
}
  0x24   :  { %96 = dma.hbm_to_vmem [thread:$0]  %s2663_s6, 512, %s91_s16, [#allocation12], %s2368_s26, %s2368_s26, %s2369_s27  }
  0x25   :  { %s2242_s3 = scalar_lea.vmem %s29_s18, 256  ;;  %p2247_p2 = scmp.lt.s32.totalorder %s29_s18, %s29_s18 }
  0x26   :  { %p2243_p1 = scmp.ne.s32.totalorder %s29_s18, %s2242_s3  ;;  %p2248_p3 = scmp.lt.s32.totalorder %s2242_s3, %s2242_s3 }
  0x28   :  { %p2249_p4 = por %p2248_p3, %p2247_p2 }
  0x2a   :  { %p2250_p5 = pnand %p2249_p4, %p2243_p1 }
  0x2c   :  { %2253 = shalt.err (!%p2250_p5)
}
  0x2d   :  { %34 = dma.hbm_to_vmem [thread:$0]  %s2657_s0, 256, %s29_s18, [#allocation3], %s2368_s26, %s2368_s26, %s2369_s27  }
  0x2e   :  { %s2372_s23 = smov [#allocation7]   ;;  %s2373_s25 = smov [#allocation10]  }
  0x2f   :  { %s52_s24 = sshll.u32 %s2372_s23, 4  ;;  %s76_s28 = sshll.u32 %s2373_s25, 4  ;;  %s53_s24 = int_to_ptr.vmem [resolvable:$true] %s52_s24  ;;  %s77_s28 = int_to_ptr.vmem [resolvable:$true] %s76_s28 }
  0x30   :  { %s2262_s6 = scalar_lea.vmem %s53_s24, 256  ;;  %p2267_p7 = scmp.lt.s32.totalorder %s53_s24, %s53_s24 }
  0x31   :  { %p2263_p6 = scmp.ne.s32.totalorder %s53_s24, %s2262_s6  ;;  %p2268_p8 = scmp.lt.s32.totalorder %s2262_s6, %s2262_s6 }
  0x33   :  { %p2269_p9 = por %p2268_p8, %p2267_p7 }
  0x35   :  { %p2270_p10 = pnand %p2269_p9, %p2263_p6 }
  0x37   :  { %2273 = shalt.err (!%p2270_p10)
}
  0x38   :  { %58 = dma.hbm_to_vmem [thread:$0]  %s2659_s2, 256, %s53_s24, [#allocation6], %s2368_s26, %s2368_s26, %s2369_s27  }
  0x39   :  { %s2282_s0 = scalar_lea.vmem %s77_s28, 512  ;;  %p2287_p12 = scmp.lt.s32.totalorder %s77_s28, %s77_s28 }
  0x3a   :  { %p2283_p11 = scmp.ne.s32.totalorder %s77_s28, %s2282_s0  ;;  %p2288_p13 = scmp.lt.s32.totalorder %s2282_s0, %s2282_s0 }
  0x3c   :  { %p2289_p0 = por %p2288_p13, %p2287_p12 }
  0x3e   :  { %p2290_p1 = pnand %p2289_p0, %p2283_p11 }
  0x40   :  { %2293 = shalt.err (!%p2290_p1)
}
  0x41   :  { %82 = dma.hbm_to_vmem [thread:$0]  %s2661_s4, 512, %s77_s28, [#allocation9], %s2368_s26, %s2368_s26, %s2369_s27  }
  0x42   :  { %s2374_s15 = smov [#allocation13]   ;;  %s2375_s17 = smov [#allocation14]  }
  0x43   :  { %s104_s16 = sshll.u32 %s2374_s15, 4  ;;  %s118_s18 = sshll.u32 %s2375_s17, 4  ;;  %s105_s16 = int_to_ptr.vmem [resolvable:$true] %s104_s16  ;;  %s119_s18 = int_to_ptr.vmem [resolvable:$true] %s118_s18 }
  0x44   :  { %s2302_s2 = scalar_lea.vmem %s105_s16, 512  ;;  %p2307_p3 = scmp.lt.s32.totalorder %s105_s16, %s105_s16 }
  0x45   :  { %p2303_p2 = scmp.ne.s32.totalorder %s105_s16, %s2302_s2  ;;  %p2308_p4 = scmp.lt.s32.totalorder %s2302_s2, %s2302_s2 }
  0x47   :  { %p2309_p5 = por %p2308_p4, %p2307_p3 }
  0x49   :  { %p2310_p6 = pnand %p2309_p5, %p2303_p2 }
  0x4b   :  { %2313 = shalt.err (!%p2310_p6)
}
  0x4c   :  { %110 = dma.hbm_to_vmem [thread:$0]  %s2665_s8, 512, %s105_s16, [#allocation12], %s2368_s26, %s2368_s26, %s2369_s27  }
  0x4d   :  { %s2322_s4 = scalar_lea.vmem %s119_s18, 512  ;;  %p2327_p8 = scmp.lt.s32.totalorder %s119_s18, %s119_s18 }
  0x4e   :  { %p2323_p7 = scmp.ne.s32.totalorder %s119_s18, %s2322_s4  ;;  %p2328_p9 = scmp.lt.s32.totalorder %s2322_s4, %s2322_s4 }
  0x50   :  { %p2329_p10 = por %p2328_p9, %p2327_p8 }
  0x52   :  { %p2330_p11 = pnand %p2329_p10, %p2323_p7 }
  0x54   :  { %2333 = shalt.err (!%p2330_p11)
}
  0x55   :  { %124 = dma.hbm_to_vmem [thread:$0]  %s2667_s10, 512, %s119_s18, [#allocation15], %s2368_s26, %s2368_s26, %s2369_s27  }
  0x56   :  { %2354 = dma.done.wait [#allocation3], 256  }
  0x57   :  { %2355 = vsyncadd [#allocation3], 4294967040 }
  0x58   :  { %2356 = dma.done.wait [#allocation6], 512  }
  0x59   :  { %2357 = vsyncadd [#allocation6], 4294966784 }
  0x5a   :  { %2358 = dma.done.wait [#allocation9], 768  }
  0x5b   :  { %2359 = vsyncadd [#allocation9], 4294966528 }
  0x5c   :  { %2360 = dma.done.wait [#allocation12], 1024  }
  0x5d   :  { %2361 = vsyncadd [#allocation12], 4294966272 }
  0x5e   :  { %2362 = dma.done.wait [#allocation15], 512  }
  0x5f   :  { %2363 = vsyncadd [#allocation15], 4294966784  ;;  %v253_v0 = vld [vmem:[#allocation11 + $0x18] sm:$0xff]  ;;  %v252_v2 = vld [vmem:[#allocation11 + $0x10] sm:$0xff]  ;;  %vm168_vm0 = vcmask 261120   ;;  %v2376_v12 = vmov 0.0  }
  0x60   :  { %v160_v1 = vld [vmem:[#allocation10 + $0x18] sm:$0xff]  ;;  %2011 = vmatprep.subr.mxu1 %v253_v0  ;;  %v159_v3 = vld [vmem:[#allocation10 + $0x10] sm:$0xff]  ;;  %v251_v4 = vld [vmem:[#allocation11 + $0x8] sm:$0xff]  ;;  %vm2377_vm1 = vmmov 0   ;;  %vm482_vm2 = vcmask 64512   ;;  %s2380_s23 = smov 104  }
  0x61   :  { %2000 = vmatprep.subr.mxu0 %v160_v1  ;;  %2012 = vmatpush3.msra.mxu1 %v253_v0  ;;  %v158_v5 = vld [vmem:[#allocation10 + $0x8] sm:$0xff]  ;;  %v250_v6 = vld [vmem:[#allocation11] sm:$0xff]  ;;  %v153_v7 = vld [vmem:[#allocation5] sm:$0xff]  ;;  %s2382_s28 = smov 24   ;;  %vm1787_vm5 = vcmask 130048   ;;  %vm1790_vm6 = vcmask 195584  }
  0x62   :  { %2001 = vmatpush3.msra.mxu0 %v160_v1  ;;  %2013 = vmatprep.subr.mxu1 %v252_v2  ;;  %v157_v8 = vld [vmem:[#allocation10] sm:$0xff]  ;;  %v154_v9 = vld [vmem:[#allocation5 + $0x8] sm:$0xff]  ;;  %v152_v11 = vld [vmem:[#allocation2 + $0x8] sm:$0xff]  ;;  %s2383_s30 = smov [#allocation16]  }
  0x63   :  { %2002 = vmatprep.subr.mxu0 %v159_v3  ;;  %2014 = vmatpush3.msra.mxu1 %v252_v2  ;;  %v151_v10 = vld [vmem:[#allocation2] sm:$0xff]  ;;  %v345_v13 = vld [vmem:[#allocation13 + $0x18] sm:$0xff]  ;;  %v344_v14 = vld [vmem:[#allocation13 + $0x10] sm:$0xff]  ;;  %s1892_s0 = sshll.u32 %s2383_s30, 4  ;;  %s1893_s0 = int_to_ptr.vmem [resolvable:$true] %s1892_s0 }
  0x64   :  { %2003 = vmatpush3.msra.mxu0 %v159_v3  ;;  %2015 = vmatprep.subr.mxu1 %v251_v4  ;;  %v343_v15 = vld [vmem:[#allocation13 + $0x8] sm:$0xff]  ;;  %v342_v16 = vld [vmem:[#allocation13] sm:$0xff]  ;;  %v1075_v42 = vld [vmem:[#allocation8] sm:$0xff]  ;;  %s2334_s13 = scalar_lea.vmem %s1893_s0, 256  ;;  %p2339_p13 = scmp.lt.s32.totalorder %s1893_s0, %s1893_s0 }
  0x65   :  { %2004 = vmatprep.subr.mxu0 %v158_v5  ;;  %2016 = vmatpush3.msra.mxu1 %v251_v4  ;;  %v155_v17 = vld [vmem:[#allocation7] sm:$0xff]  ;;  %v156_v19 = vld [vmem:[#allocation7 + $0x8] sm:$0xff]  ;;  %vm1077_vm3 = vcmp.eq.f32.partialorder %v1075_v42, 0.0  ;;  %v1076_v47 = vld [vmem:[#allocation8 + $0x8] sm:$0xff]  ;;  %p2335_p12 = scmp.ne.s32.totalorder %s1893_s0, %s2334_s13  ;;  %p2340_p0 = scmp.lt.s32.totalorder %s2334_s13, %s2334_s13 }
  0x66   :  { %2005 = vmatpush3.msra.mxu0 %v158_v5  ;;  %2017 = vmatprep.subr.mxu1 %v250_v6  ;;  %v1911_v18 = vld [vmem:[%s2664_s7] ss:$0 sm:$0xff]  ;;  %s2378_s7 = smov 120   ;;  %v1079_v48 = vsel %vm1077_vm3, -1e+09, %v2376_v12  ;;  %vm1078_vm4 = vcmp.eq.f32.partialorder %v1076_v47, 0.0 }
  0x67   :  { %2019 = vmatprep.mubr.msk.f32.mxu1 %vm168_vm0, %v153_v7  ;;  %2018 = vmatpush3.msra.mxu1 %v250_v6  ;;  %v1908_v21 = vld [vmem:[%s2662_s5] ss:$0 sm:$0xff]  ;;  %s2379_s5 = smov 112   ;;  %v1080_v52 = vsel %vm1078_vm4, -1e+09, %v2376_v12  ;;  %p2341_p1 = por %p2340_p0, %p2339_p13 }
  0x68   :  { %2006 = vmatprep.subr.mxu0 %v157_v8  ;;  %2020 = vmatmul.mubr.msk.f32.vlgmr.msra.gmra.mxu1 %vm168_vm0, %v154_v9  ;;  %v1914_v41 = vld [vmem:[%s2666_s9] ss:$0 sm:$0xff]  ;;  %s2381_s9 = smov 16  }
  0x69   :  { %2007 = vmatpush3.msra.mxu0 %v157_v8  ;;  %2008 = vmatprep.mubr.msk.f32.mxu0 %vm168_vm0, %v151_v10  ;;  %p2342_p2 = pnand %p2341_p1, %p2335_p12 }
  0x6a   :  { %2009 = vmatmul.mubr.msk.f32.vlgmr.msra.gmra.mxu0 %vm168_vm0, %v152_v11  ;;  %2033 = vmatprep.subr.mxu1 %v2376_v12 }
  0x6b   :  { %2035 = vmatprep.mubr.msk.f32.mxu1 %vm2377_vm1, %v2376_v12  ;;  %2022 = vmatprep.subr.mxu0 %v345_v13 }
  0x6c   :  { %2023 = vmatpush3.msra.mxu0 %v345_v13  ;;  %2030 = vmatprep.mubr.msk.f32.mxu0 %vm168_vm0, %v155_v17 }
  0x6d   :  { %2024 = vmatprep.subr.mxu0 %v344_v14 }
  0x6e   :  { %2025 = vmatpush3.msra.mxu0 %v344_v14 }
  0x6f   :  { %2026 = vmatprep.subr.mxu0 %v343_v15 }
  0x70   :  { %2027 = vmatpush3.msra.mxu0 %v343_v15 }
  0x71   :  { %2028 = vmatprep.subr.mxu0 %v342_v16 }
  0x72   :  { %2029 = vmatpush3.msra.mxu0 %v342_v16 }
  0x73   :  { %2053 = vmatprep.subr.mxu0 %v2376_v12  ;;  %2031 = vmatmul.mubr.msk.f32.vlgmr.msra.gmra.mxu0 %vm168_vm0, %v156_v19 }
  0x74   :  { %2055 = vmatprep.mubr.msk.f32.mxu0 %vm2377_vm1, %v2376_v12 }
 0x128   :  { %v2021_v20 = vpop.f32.mrf.mxu1 }
 0x129   :  { %v339_v22 = vadd.f32 %v2021_v20, %v1911_v18 }
 0x12a   :  { %v2010_v23 = vpop.f32.mrf.mxu0  ;;  %v333_v24 = vpop.f32.mrf.mxu1 }
 0x12b   :  { %v247_v25 = vadd.f32 %v2010_v23, %v1908_v21  ;;  %v334_v26 = vadd.f32 %v1911_v18, %v333_v24  ;;  %452 = vrot.lane.b32.xlu1 %v339_v22, %s2378_s7 }
 0x12c   :  { %v241_v27 = vpop.f32.mrf.mxu0 }
 0x12d   :  { %v242_v28 = vadd.f32 %v1908_v21, %v241_v27  ;;  %450 = vrot.lane.b32.xlu0 %v334_v26, %s2378_s7  ;;  %2034 = vmatpush3.xpose.msk.msra.mxu1 %vm482_vm2, %v334_v26 }
 0x12e   :  { %2038 = vmatprep.subr.mxu1 %v2376_v12 }
 0x12f   :  { %438 = vrot.lane.b32.xlu1 %v247_v25, %s2378_s7 }
 0x130   :  { %2036 = vmatmul.mubr.msk.f32.vlgmr.msra.gmra.mxu1 %vm482_vm2, %v242_v28 }
 0x131   :  { %436 = vrot.lane.b32.xlu0 %v242_v28, %s2378_s7  ;;  %2039 = vmatpush3.xpose.msk.msra.mxu1 %vm482_vm2, %v339_v22 }
 0x132   :  { %2040 = vmatprep.mubr.msk.f32.mxu1 %vm2377_vm1, %v2376_v12  ;;  %2043 = vmatprep.subr.mxu1 %v2376_v12 }
 0x133   :  { %456 = vrot.lane.b32.xlu1 %v339_v22, %s2379_s5  ;;  %v2032_v43 = vpop.f32.mrf.mxu0 }
 0x134   :  { %2041 = vmatmul.mubr.msk.f32.vlgmr.msra.gmra.mxu1 %vm482_vm2, %v247_v25  ;;  %v2570_v44 = vadd.f32 %v2032_v43, %v1914_v41 }
 0x135   :  { %454 = vrot.lane.b32.xlu0 %v334_v26, %s2379_s5  ;;  %2045 = vmatprep.mubr.msk.f32.mxu1 %vm2377_vm1, %v2376_v12  ;;  %v425_v45 = vpop.f32.mrf.mxu0 }
 0x136   :  { %v2572_v46 = vadd.f32 %v1914_v41, %v425_v45 }
 0x137   :  { %442 = vrot.lane.b32.xlu1 %v247_v25, %s2379_s5 }
 0x139   :  { %440 = vrot.lane.b32.xlu0 %v242_v28, %s2379_s5 }
 0x13b   :  { %460 = vrot.lane.b32.xlu1 %v339_v22, %s2380_s23 }
 0x13d   :  { %458 = vrot.lane.b32.xlu0 %v334_v26, %s2380_s23 }
 0x13f   :  { %446 = vrot.lane.b32.xlu1 %v247_v25, %s2380_s23 }
 0x141   :  { %444 = vrot.lane.b32.xlu0 %v242_v28, %s2380_s23 }
 0x19d   :  { %v453_v29 = vpop.permute.xlu1 %452 }
 0x19f   :  { %v451_v30 = vpop.permute.xlu0 %450 }
 0x1a0   :  { %2044 = vmatpush3.xpose.msk.msra.mxu1 %vm482_vm2, %v451_v30 }
 0x1a1   :  { %v439_v31 = vpop.permute.xlu1 %438  ;;  %2048 = vmatprep.subr.mxu1 %v2376_v12 }
 0x1a3   :  { %v437_v32 = vpop.permute.xlu0 %436 }
 0x1a4   :  { %2046 = vmatmul.mubr.msk.f32.vlgmr.msra.gmra.mxu1 %vm482_vm2, %v437_v32 }
 0x1a5   :  { %2049 = vmatpush3.xpose.msk.msra.mxu1 %vm482_vm2, %v453_v29  ;;  %v457_v33 = vpop.permute.xlu1 %456  ;;  %2050 = vmatprep.mubr.msk.f32.mxu1 %vm2377_vm1, %v2376_v12 }
 0x1a6   :  { %2058 = vmatprep.subr.mxu1 %v2376_v12 }
 0x1a7   :  { %v455_v34 = vpop.permute.xlu0 %454 }
 0x1a8   :  { %2051 = vmatmul.mubr.msk.f32.vlgmr.msra.gmra.mxu1 %vm482_vm2, %v439_v31  ;;  %2054 = vmatpush3.xpose.msk.msra.mxu0 %vm482_vm2, %v455_v34 }
 0x1a9   :  { %2059 = vmatpush3.xpose.msk.msra.mxu1 %vm482_vm2, %v457_v33  ;;  %v443_v35 = vpop.permute.xlu1 %442  ;;  %2060 = vmatprep.mubr.msk.f32.mxu1 %vm2377_vm1, %v2376_v12 }
 0x1aa   :  { %2068 = vmatprep.subr.mxu1 %v2376_v12  ;;  %2063 = vmatprep.subr.mxu0 %v2376_v12 }
 0x1ab   :  { %v441_v36 = vpop.permute.xlu0 %440 }
 0x1ac   :  { %2056 = vmatmul.mubr.msk.f32.vlgmr.msra.gmra.mxu0 %vm482_vm2, %v441_v36  ;;  %2061 = vmatmul.mubr.msk.f32.vlgmr.msra.gmra.mxu1 %vm482_vm2, %v443_v35 }
 0x1ad   :  { %v461_v37 = vpop.permute.xlu1 %460  ;;  %2070 = vmatprep.mubr.msk.f32.mxu1 %vm2377_vm1, %v2376_v12  ;;  %2065 = vmatprep.mubr.msk.f32.mxu0 %vm2377_vm1, %v2376_v12 }
 0x1ae   :  { %2069 = vmatpush3.xpose.msk.msra.mxu1 %vm482_vm2, %v461_v37 }
 0x1af   :  { %v459_v38 = vpop.permute.xlu0 %458  ;;  %2078 = vmatprep.subr.mxu1 %v2376_v12 }
 0x1b0   :  { %2064 = vmatpush3.xpose.msk.msra.mxu0 %vm482_vm2, %v459_v38 }
 0x1b1   :  { %v447_v39 = vpop.permute.xlu1 %446  ;;  %2073 = vmatprep.subr.mxu0 %v2376_v12 }
 0x1b2   :  { %2071 = vmatmul.mubr.msk.f32.vlgmr.msra.gmra.mxu1 %vm482_vm2, %v447_v39 }
 0x1b3   :  { %v445_v40 = vpop.permute.xlu0 %444  ;;  %2080 = vmatprep.mubr.msk.f32.mxu1 %vm2377_vm1, %v2376_v12  ;;  %2079 = vmatpush3.msra.mxu1 %v2570_v44 }
 0x1b4   :  { %2066 = vmatmul.mubr.msk.f32.vlgmr.msra.gmra.mxu0 %vm482_vm2, %v445_v40  ;;  %2088 = vmatprep.subr.mxu1 %v2376_v12 }
 0x1b5   :  { %2075 = vmatprep.mubr.msk.f32.mxu0 %vm2377_vm1, %v2376_v12  ;;  %2074 = vmatpush3.msra.mxu0 %v2572_v46 }
 0x1b6   :  { %2083 = vmatprep.subr.mxu0 %v2376_v12 }
 0x1f0   :  { %v553_v49 = vpop.f32.mrf.mxu1 }
 0x1f1   :  { %v1081_v50 = vadd.f32 %v1079_v48, %v553_v49 }
 0x1f2   :  { %v2037_v51 = vpop.f32.mrf.mxu1 }
 0x1f3   :  { %v1089_v53 = vsel %vm482_vm2, %v1081_v50, -inf }
 0x1f4   :  { %1090 = vmax.xlane.f32.xlu0 %v1089_v53  ;;  %v627_v54 = vpop.f32.mrf.mxu1 }
 0x1f5   :  { %v1082_v55 = vadd.f32 %v1080_v52, %v627_v54 }
 0x1f6   :  { %v2042_v56 = vpop.f32.mrf.mxu1 }
 0x1f7   :  { %v1092_v57 = vsel %vm482_vm2, %v1082_v55, -inf }
 0x1f8   :  { %1093 = vmax.xlane.f32.xlu1 %v1092_v57 }
 0x264   :  { %v701_v58 = vpop.f32.mrf.mxu1 }
 0x265   :  { %v1083_v59 = vadd.f32 %v1079_v48, %v701_v58 }
 0x266   :  { %v2047_v60 = vpop.f32.mrf.mxu1 }
 0x267   :  { %v1095_v61 = vsel %vm482_vm2, %v1083_v59, -inf }
 0x268   :  { %1096 = vmax.xlane.f32.xlu0 %v1095_v61  ;;  %v775_v62 = vpop.f32.mrf.mxu1 }
 0x269   :  { %v1084_v63 = vadd.f32 %v1080_v52, %v775_v62 }
 0x26a   :  { %v2052_v0 = vpop.f32.mrf.mxu1 }
 0x26b   :  { %v1098_v1 = vsel %vm482_vm2, %v1084_v63, -inf }
 0x26c   :  { %v849_v2 = vpop.f32.mrf.mxu0  ;;  %1099 = vmax.xlane.f32.xlu0 %v1098_v1  ;;  %v923_v3 = vpop.f32.mrf.mxu1 }
 0x26d   :  { %v1085_v4 = vadd.f32 %v1079_v48, %v849_v2  ;;  %v1086_v5 = vadd.f32 %v1080_v52, %v923_v3 }
 0x26e   :  { %v2057_v6 = vpop.f32.mrf.mxu0  ;;  %v2062_v7 = vpop.f32.mrf.mxu1 }
 0x26f   :  { %v1101_v8 = vsel %vm482_vm2, %v1085_v4, -inf  ;;  %v1104_v9 = vsel %vm482_vm2, %v1086_v5, -inf }
 0x270   :  { %1102 = vmax.xlane.f32.xlu1 %v1101_v8  ;;  %1105 = vmax.xlane.f32.xlu0 %v1104_v9 }
 0x272   :  { %v1071_v10 = vpop.f32.mrf.mxu1 }
 0x273   :  { %v1088_v11 = vadd.f32 %v1080_v52, %v1071_v10 }
 0x274   :  { %v997_v13 = vpop.f32.mrf.mxu0  ;;  %v2072_v14 = vpop.f32.mrf.mxu1 }
 0x275   :  { %v1087_v15 = vadd.f32 %v1079_v48, %v997_v13  ;;  %v1110_v16 = vsel %vm482_vm2, %v1088_v11, -inf }
 0x276   :  { %v2067_v17 = vpop.f32.mrf.mxu0  ;;  %1111 = vmax.xlane.f32.xlu0 %v1110_v16 }
 0x277   :  { %v1107_v18 = vsel %vm482_vm2, %v1087_v15, -inf }
 0x278   :  { %1108 = vmax.xlane.f32.xlu1 %v1107_v18 }
 0x27d   :  { %v1091_v22 = vpop.xlane.xlu0 %1090 }
 0x27e   :  { %v1113_v23 = vsub.f32 %v1081_v50, %v1091_v22 }
 0x280   :  { %v1121_v24 = vmul.f32 1.442695, %v1113_v23 }
 0x281   :  { %v1094_v19 = vpop.xlane.xlu1 %1093 }
 0x282   :  { %v1114_v20 = vsub.f32 %v1082_v55, %v1094_v19 }
 0x284   :  { %v1123_v21 = vmul.f32 1.442695, %v1114_v20 }
 0x286   :  { %2142 = vpow2.f32 %v1123_v21 }
 0x287   :  { %2144 = vpow2.f32 %v1121_v24 }
 0x289   :  { %464 = vrot.lane.b32.xlu1 %v2572_v46, %s2378_s7 }
 0x28c   :  { %466 = vrot.lane.b32.xlu0 %v2570_v44, %s2378_s7 }
 0x28d   :  { %470 = vrot.lane.b32.xlu1 %v2572_v46, %s2379_s5 }
 0x291   :  { %472 = vrot.lane.b32.xlu1 %v2570_v44, %s2379_s5 }
 0x293   :  { %v2143_v25 = vpop.eup %2142 }
 0x294   :  { %v1140_v26 = vsel %vm482_vm2, %v2143_v25, 0.0  ;;  %v2145_v27 = vpop.eup %2144 }
 0x295   :  { %v1137_v28 = vsel %vm482_vm2, %v2145_v27, 0.0 }
 0x2ab   :  { %1141 = vadd.xlane.f32.xlu0 %v1140_v26 }
 0x2b5   :  { %1138 = vadd.xlane.f32.xlu1 %v1137_v28 }
 0x2f1   :  { %v1097_v29 = vpop.xlane.xlu0 %1096 }
 0x2f2   :  { %v1115_v30 = vsub.f32 %v1083_v59, %v1097_v29 }
 0x2f4   :  { %v1125_v31 = vmul.f32 1.442695, %v1115_v30  ;;  %v1796_v30 = vld [vmem:[#allocation14 + $0x18] sm:$0xff] }
 0x2f5   :  { %v1100_v32 = vpop.xlane.xlu0 %1099 }
 0x2f6   :  { %2146 = vpow2.f32 %v1125_v31  ;;  %v1116_v33 = vsub.f32 %v1084_v63, %v1100_v32  ;;  %v1795_v31 = vld [vmem:[#allocation14 + $0x10] sm:$0xff] }
 0x2f8   :  { %v1127_v34 = vmul.f32 1.442695, %v1116_v33  ;;  %v1794_v33 = vld [vmem:[#allocation14 + $0x8] sm:$0xff] }
 0x2f9   :  { %v1103_v35 = vpop.xlane.xlu1 %1102  ;;  %v1106_v36 = vpop.xlane.xlu0 %1105 }
 0x2fa   :  { %2148 = vpow2.f32 %v1127_v34  ;;  %v1117_v37 = vsub.f32 %v1085_v4, %v1103_v35  ;;  %v1118_v38 = vsub.f32 %v1086_v5, %v1106_v36  ;;  %v1793_v35 = vld [vmem:[#allocation14] sm:$0xff] }
 0x2fc   :  { %v1129_v39 = vmul.f32 1.442695, %v1117_v37  ;;  %v1131_v40 = vmul.f32 1.442695, %v1118_v38 }
 0x2fe   :  { %2150 = vpow2.f32 %v1129_v39 }
 0x2ff   :  { %2152 = vpow2.f32 %v1131_v40  ;;  %v1112_v41 = vpop.xlane.xlu0 %1111 }
 0x300   :  { %v1120_v42 = vsub.f32 %v1088_v11, %v1112_v41 }
 0x301   :  { %v1109_v43 = vpop.xlane.xlu1 %1108 }
 0x302   :  { %v1135_v45 = vmul.f32 1.442695, %v1120_v42  ;;  %v1119_v47 = vsub.f32 %v1087_v15, %v1109_v43 }
 0x303   :  { %v2147_v48 = vpop.eup %2146  ;;  %v467_v62 = vpop.permute.xlu0 %466 }
 0x304   :  { %2154 = vpow2.f32 %v1135_v45  ;;  %v1133_v49 = vmul.f32 1.442695, %v1119_v47  ;;  %v1143_v50 = vsel %vm482_vm2, %v2147_v48, 0.0 }
 0x305   :  { %1144 = vadd.xlane.f32.xlu1 %v1143_v50  ;;  %v465_v61 = vpop.permute.xlu1 %464 }
 0x306   :  { %2156 = vpow2.f32 %v1133_v49 }
 0x307   :  { %v2149_v51 = vpop.eup %2148 }
 0x308   :  { %v1146_v52 = vsel %vm482_vm2, %v2149_v51, 0.0 }
 0x309   :  { %1147 = vadd.xlane.f32.xlu0 %v1146_v52  ;;  %v471_v63 = vpop.permute.xlu1 %470 }
 0x30b   :  { %v2151_v53 = vpop.eup %2150 }
 0x30c   :  { %v2153_v54 = vpop.eup %2152  ;;  %v1149_v55 = vsel %vm482_vm2, %v2151_v53, 0.0 }
 0x30d   :  { %1150 = vadd.xlane.f32.xlu1 %v1149_v55  ;;  %v1152_v56 = vsel %vm482_vm2, %v2153_v54, 0.0  ;;  %v473_v1 = vpop.permute.xlu1 %472 }
 0x30e   :  { %1153 = vadd.xlane.f32.xlu0 %v1152_v56 }
 0x311   :  { %v2602_v57 = vpop.eup %2154 }
 0x312   :  { %v1158_v58 = vsel %vm482_vm2, %v2602_v57, 0.0 }
 0x313   :  { %v2606_v59 = vpop.eup %2156  ;;  %1159 = vadd.xlane.f32.xlu0 %v1158_v58 }
 0x314   :  { %v1155_v60 = vsel %vm482_vm2, %v2606_v59, 0.0 }
 0x315   :  { %1156 = vadd.xlane.f32.xlu1 %v1155_v60 }
 0x326   :  { %478 = vrot.lane.b32.xlu1 %v2570_v44, %s2380_s23 }
 0x329   :  { %476 = vrot.lane.b32.xlu0 %v2572_v46, %s2380_s23 }
 0x334   :  { %v1142_v0 = vpop.xlane.xlu0 %1141 }
 0x335   :  { %2158 = vrcp.f32 %v1142_v0 }
 0x33e   :  { %v1139_v2 = vpop.xlane.xlu1 %1138 }
 0x33f   :  { %2160 = vrcp.f32 %v1139_v2 }
 0x342   :  { %v2159_v3 = vpop.eup %2158 }
 0x343   :  { %v1164_v4 = vmul.f32 %v2159_v3, %v2143_v25 }
 0x345   :  { %2081 = vmatmul.mubr.msk.f32.vlgmr.msra.gmra.mxu1 %vm482_vm2, %v1164_v4 }
 0x346   :  { %2089 = vmatpush3.msra.mxu1 %v467_v62  ;;  %2090 = vmatprep.mubr.msk.f32.mxu1 %vm2377_vm1, %v2376_v12 }
 0x347   :  { %2098 = vmatprep.subr.mxu1 %v2376_v12 }
 0x34c   :  { %v2161_v44 = vpop.eup %2160 }
 0x34d   :  { %v1162_v46 = vmul.f32 %v2161_v44, %v2145_v27 }
 0x34f   :  { %2076 = vmatmul.mubr.msk.f32.vlgmr.msra.gmra.mxu0 %vm482_vm2, %v1162_v46 }
 0x350   :  { %2084 = vmatpush3.msra.mxu0 %v465_v61  ;;  %2085 = vmatprep.mubr.msk.f32.mxu0 %vm2377_vm1, %v2376_v12 }
 0x351   :  { %2093 = vmatprep.subr.mxu0 %v2376_v12 }
 0x38e   :  { %v1145_v5 = vpop.xlane.xlu1 %1144 }
 0x38f   :  { %2162 = vrcp.f32 %v1145_v5 }
 0x392   :  { %v1148_v6 = vpop.xlane.xlu0 %1147 }
 0x393   :  { %2164 = vrcp.f32 %v1148_v6 }
 0x396   :  { %v1151_v7 = vpop.xlane.xlu1 %1150 }
 0x397   :  { %2166 = vrcp.f32 %v1151_v7  ;;  %v1154_v8 = vpop.xlane.xlu0 %1153 }
 0x398   :  { %2168 = vrcp.f32 %v1154_v8 }
 0x39c   :  { %v2163_v9 = vpop.eup %2162  ;;  %v1160_v10 = vpop.xlane.xlu0 %1159 }
 0x39d   :  { %2170 = vrcp.f32 %v1160_v10  ;;  %v1166_v11 = vmul.f32 %v2163_v9, %v2147_v48 }
 0x39e   :  { %v1157_v13 = vpop.xlane.xlu1 %1156 }
 0x39f   :  { %2172 = vrcp.f32 %v1157_v13  ;;  %2086 = vmatmul.mubr.msk.f32.vlgmr.msra.gmra.mxu0 %vm482_vm2, %v1166_v11 }
 0x3a0   :  { %v2165_v14 = vpop.eup %2164  ;;  %2094 = vmatpush3.msra.mxu0 %v471_v63  ;;  %2095 = vmatprep.mubr.msk.f32.mxu0 %vm2377_vm1, %v2376_v12  ;;  %v477_v20 = vpop.permute.xlu0 %476 }
 0x3a1   :  { %v1168_v15 = vmul.f32 %v2165_v14, %v2149_v51  ;;  %2103 = vmatprep.subr.mxu0 %v2376_v12 }
 0x3a2   :  { %v479_v21 = vpop.permute.xlu1 %478 }
 0x3a3   :  { %2091 = vmatmul.mubr.msk.f32.vlgmr.msra.gmra.mxu1 %vm482_vm2, %v1168_v15 }
 0x3a4   :  { %v2167_v16 = vpop.eup %2166  ;;  %2099 = vmatpush3.msra.mxu1 %v473_v1  ;;  %2100 = vmatprep.mubr.msk.f32.mxu1 %vm2377_vm1, %v2376_v12 }
 0x3a5   :  { %v2169_v17 = vpop.eup %2168  ;;  %2108 = vmatprep.subr.mxu1 %v2376_v12  ;;  %v1170_v18 = vmul.f32 %v2167_v16, %v2151_v53 }
 0x3a6   :  { %v1172_v19 = vmul.f32 %v2169_v17, %v2153_v54 }
 0x3a7   :  { %2096 = vmatmul.mubr.msk.f32.vlgmr.msra.gmra.mxu0 %vm482_vm2, %v1170_v18 }
 0x3a8   :  { %2101 = vmatmul.mubr.msk.f32.vlgmr.msra.gmra.mxu1 %vm482_vm2, %v1172_v19  ;;  %2104 = vmatpush3.msra.mxu0 %v477_v20 }
 0x3a9   :  { %2109 = vmatpush3.msra.mxu1 %v479_v21  ;;  %2110 = vmatprep.mubr.msk.f32.mxu1 %vm2377_vm1, %v2376_v12 }
 0x3aa   :  { %v2171_v22 = vpop.eup %2170  ;;  %2105 = vmatprep.mubr.msk.f32.mxu0 %vm2377_vm1, %v2376_v12  ;;  %2113 = vmatprep.subr.mxu0 %v1796_v30 }
 0x3ab   :  { %v1176_v23 = vmul.f32 %v2171_v22, %v2602_v57 }
 0x3ac   :  { %v2173_v24 = vpop.eup %2172 }
 0x3ad   :  { %2111 = vmatmul.mubr.msk.f32.vlgmr.msra.gmra.mxu1 %vm482_vm2, %v1176_v23  ;;  %v1174_v25 = vmul.f32 %v2173_v24, %v2606_v59  ;;  %v1941_v59 = vld [vmem:[%s2668_s11] ss:$0 sm:$0xff] }
 0x3af   :  { %2106 = vmatmul.mubr.msk.f32.vlgmr.msra.gmra.mxu0 %vm482_vm2, %v1174_v25 }
 0x3b0   :  { %2114 = vmatpush3.msra.mxu0 %v1796_v30 }
 0x3b1   :  { %2115 = vmatprep.subr.mxu0 %v1795_v31 }
 0x3b2   :  { %2116 = vmatpush3.msra.mxu0 %v1795_v31 }
 0x3b3   :  { %2117 = vmatprep.subr.mxu0 %v1794_v33 }
 0x3b4   :  { %2118 = vmatpush3.msra.mxu0 %v1794_v33 }
 0x3b5   :  { %2119 = vmatprep.subr.mxu0 %v1793_v35 }
 0x3b6   :  { %2120 = vmatpush3.msra.mxu0 %v1793_v35 }
 0x405   :  { %v1319_v26 = vpop.f32.mrf.mxu1 }
 0x407   :  { %v2082_v27 = vpop.f32.mrf.mxu1 }
 0x40f   :  { %v1246_v28 = vpop.f32.mrf.mxu0 }
 0x411   :  { %v2077_v29 = vpop.f32.mrf.mxu0 }
 0x45f   :  { %v1392_v32 = vpop.f32.mrf.mxu0 }
 0x460   :  { %1763 = vrot.lane.b32.xlu0 %v1392_v32, %s2369_s27 }
 0x461   :  { %v2087_v12 = vpop.f32.mrf.mxu0 }
 0x463   :  { %v1465_v34 = vpop.f32.mrf.mxu1 }
 0x464   :  { %1765 = vrot.lane.b32.xlu1 %v1465_v34, %s2369_s27 }
 0x465   :  { %v2092_v36 = vpop.f32.mrf.mxu1 }
 0x467   :  { %v1538_v37 = vpop.f32.mrf.mxu0 }
 0x468   :  { %v1611_v38 = vpop.f32.mrf.mxu1  ;;  %1771 = vrot.lane.b32.xlu0 %v1538_v37, %s2381_s9 }
 0x469   :  { %1773 = vrot.lane.b32.xlu1 %v1611_v38, %s2381_s9  ;;  %v2097_v39 = vpop.f32.mrf.mxu0 }
 0x46a   :  { %v2102_v40 = vpop.f32.mrf.mxu1 }
 0x46d   :  { %v1757_v41 = vpop.f32.mrf.mxu1 }
 0x46e   :  { %1781 = vrot.lane.b32.xlu1 %v1757_v41, %s2382_s28 }
 0x46f   :  { %v1684_v42 = vpop.f32.mrf.mxu0  ;;  %v2112_v43 = vpop.f32.mrf.mxu1 }
 0x470   :  { %1779 = vrot.lane.b32.xlu0 %v1684_v42, %s2382_s28 }
 0x471   :  { %v2107_v45 = vpop.f32.mrf.mxu0 }
 0x4d2   :  { %v1764_v48 = vpop.permute.xlu0 %1763 }
 0x4d3   :  { %v1785_v51 = vsel %vm482_vm2, %v1246_v28, %v1764_v48 }
 0x4d6   :  { %v1766_v47 = vpop.permute.xlu1 %1765 }
 0x4d7   :  { %v1786_v53 = vsel %vm482_vm2, %v1319_v26, %v1766_v47 }
 0x4da   :  { %v1772_v50 = vpop.permute.xlu0 %1771 }
 0x4db   :  { %v1774_v49 = vpop.permute.xlu1 %1773  ;;  %v1788_v54 = vsel %vm1787_vm5, %v1785_v51, %v1772_v50 }
 0x4dc   :  { %v1789_v56 = vsel %vm1787_vm5, %v1786_v53, %v1774_v49 }
 0x4e0   :  { %v1782_v52 = vpop.permute.xlu1 %1781 }
 0x4e1   :  { %v1792_v58 = vsel %vm1790_vm6, %v1789_v56, %v1782_v52 }
 0x4e2   :  { %v1780_v55 = vpop.permute.xlu0 %1779 }
 0x4e3   :  { %v1791_v57 = vsel %vm1790_vm6, %v1788_v54, %v1780_v55 }
 0x4e4   :  { %2121 = vmatprep.mubr.msk.f32.mxu0 %vm168_vm0, %v1791_v57 }
 0x4e5   :  { %2122 = vmatmul.mubr.msk.f32.vlgmr.msra.gmra.mxu0 %vm168_vm0, %v1792_v58 }
 0x5a5   :  { %v2123_v60 = vpop.f32.mrf.mxu0 }
 0x5a6   :  { %v1882_v61 = vadd.f32 %v2123_v60, %v1941_v59 }
 0x5a7   :  { %v1876_v62 = vpop.f32.mrf.mxu0 }
 0x5a8   :  { %1886 = vst.msk [vmem:[#allocation16 + $0x8] sm:$0xff] %vm168_vm0, %v1882_v61  ;;  %v1877_v63 = vadd.f32 %v1941_v59, %v1876_v62 }
 0x5aa   :  { %1885 = vst.msk [vmem:[#allocation16] sm:$0xff] %vm168_vm0, %v1877_v63 }
 0x5ab   :  { %2345 = shalt.err (!%p2342_p2)
}
 0x5ac   :  { %1898 = dma.vmem_to_hbm [thread:$0]  %s1893_s0, 256, %s2669_s12, [#allocation4], %s2368_s26, %s2368_s26, %s2369_s27  }
 0x5ad   :  { %2364 = dma.done.wait [#allocation4], 256  }
 0x5ae   :  { %2365 = vsyncadd [#allocation4], 4294967040 }
 0x5af   :  { %1902 = vsyncpa [#allocation3], 1 }
 0x5b0   :  { %1903 = vsyncpa [#allocation6], 1 }
 0x5b1   :  { %1904 = vsyncpa [#allocation9], 1 }
 0x5b2   :  { %1905 = vsyncpa [#allocation12], 1 }
 0x5b3   :  { %1906 = vsyncpa [#allocation15], 1 }
 0x5b4   :  { %1907 = vsyncpa [#allocation4], 1 }

</bundles_post_ra>
